<compile_context>
chip_gen: v6e
topology: v6e:2x2x1
jax: 0.10.0
libtpu: 0.0.40
codegen_flags: <defaults>
</compile_context>

<pallas_src>
import functools

import jax
import jax.numpy as jnp
from jax.experimental import pallas as pl
from jax.experimental.pallas import tpu as pltpu


def _round_up(x, m):
    return ((x + m - 1) // m) * m


def ssl_loss_kernel(e1_ref, e2_ref, w1a_ref, w1b_ref, b1_ref, w2_ref, b2_ref,
                    lbl_ref, out_ref, acc_ref, *, n_pairs):
    # e1_ref/e2_ref : [TP, D] f32    w1a_ref/w1b_ref : [D, H] f32
    # b1_ref : [1, H]   w2_ref : [H, C]   b2_ref : [1, C]
    # lbl_ref: [TP, 1] int32
    # out_ref: [1, 1] f32 (scalar loss)   acc_ref: [1, 1] f32 VMEM scratch
    i = pl.program_id(0)

    @pl.when(i == 0)
    def _():
        acc_ref[...] = jnp.zeros_like(acc_ref)

    # Fused "concat" matmul: cat([e1, e2], 1) @ W1 == e1 @ W1[:D] + e2 @ W1[D:]
    h1 = (jnp.dot(e1_ref[...], w1a_ref[...], preferred_element_type=jnp.float32)
          + jnp.dot(e2_ref[...], w1b_ref[...], preferred_element_type=jnp.float32)
          + b1_ref[...])
    h1 = jnp.maximum(h1, 0.0)
    h = jnp.dot(h1, w2_ref[...], preferred_element_type=jnp.float32) + b2_ref[...]

    # Folded log-softmax + NLL epilogue (logp never materialized):
    #   -logp[i, y_i] = max_i + log(sum_c exp(h_ic - max_i)) - h[i, y_i]
    m = jnp.max(h, axis=1, keepdims=True)                              # [TP, 1]
    lse = jnp.log(jnp.sum(jnp.exp(h - m), axis=1, keepdims=True))      # [TP, 1]
    tp, c = h.shape
    classes = jax.lax.broadcasted_iota(jnp.int32, (tp, c), 1)
    onehot = (classes == lbl_ref[...]).astype(jnp.float32)             # [TP, C]
    picked = jnp.sum(onehot * h, axis=1, keepdims=True)                # [TP, 1]
    per_row = m + lse - picked                                         # -logp[y]

    # Mask rows that are only padding (P rounded up to a multiple of TP).
    row_ids = i * tp + jax.lax.broadcasted_iota(jnp.int32, (tp, 1), 0)
    per_row = jnp.where(row_ids < n_pairs, per_row, 0.0)

    acc_ref[...] += jnp.sum(per_row, axis=0, keepdims=True)            # [1, 1]

    @pl.when(i == pl.num_programs(0) - 1)
    def _():
        # Single write of the mean NLL; output tile is touched exactly once.
        out_ref[...] = acc_ref[...] / jnp.float32(n_pairs)


def ssl_forward(embed, index_1, index_2, labels, w1, b1, w2, b2, *, tile_rows=None):
    """embed:[N,D]; index_1/index_2/labels:[P]; w1:[2D,H] (pre-transposed); w2:[H,C]."""
    embed = embed.astype(jnp.float32)
    D = embed.shape[1]
    P = int(index_1.shape[0])
    H = w1.shape[1]
    C = w2.shape[1]

    # Row gather stays in XLA; the concat is fused into the kernel by splitting
    # W1 into its top/bottom halves (avoids one HBM round-trip of [P, 2D]).
    e1 = jnp.take(embed, index_1, axis=0)
    e2 = jnp.take(embed, index_2, axis=0)
    w1a = w1[:D].astype(jnp.float32)
    w1b = w1[D:].astype(jnp.float32)
    b1_2d = b1.reshape(1, H).astype(jnp.float32)
    b2_2d = b2.reshape(1, C).astype(jnp.float32)
    w2f = w2.astype(jnp.float32)

    # Row-tile size: multiple of 8 (sublane), capped at 256 (v6e/v7x MXU height).
    if tile_rows is None:
        tile_rows = min(_round_up(P, 8), 256)
    p_pad = _round_up(P, tile_rows)
    grid = p_pad // tile_rows

    pad = p_pad - P
    if pad:
        e1 = jnp.pad(e1, ((0, pad), (0, 0)))
        e2 = jnp.pad(e2, ((0, pad), (0, 0)))
        labels = jnp.pad(labels, (0, pad))
    lbl = labels.reshape(p_pad, 1).astype(jnp.int32)

    kernel = functools.partial(ssl_loss_kernel, n_pairs=P)

    cost = pl.CostEstimate(
        flops=2 * P * (2 * D * H + H * C),
        transcendentals=P * (C + 1),  # exp per class + log per row
        bytes_accessed=(2 * p_pad * D + 2 * D * H + H + H * C + C + 1) * 4
        + p_pad * 4,
    )

    loss = pl.pallas_call(
        kernel,
        out_shape=jax.ShapeDtypeStruct((1, 1), jnp.float32),
        grid_spec=pltpu.PrefetchScalarGridSpec(
            num_scalar_prefetch=0,
            grid=(grid,),
            in_specs=[
                pl.BlockSpec((tile_rows, D), lambda i: (i, 0)),  # e1 tile
                pl.BlockSpec((tile_rows, D), lambda i: (i, 0)),  # e2 tile
                pl.BlockSpec((D, H), lambda i: (0, 0)),          # W1 top half
                pl.BlockSpec((D, H), lambda i: (0, 0)),          # W1 bottom half
                pl.BlockSpec((1, H), lambda i: (0, 0)),          # b1
                pl.BlockSpec((H, C), lambda i: (0, 0)),          # W2
                pl.BlockSpec((1, C), lambda i: (0, 0)),          # b2
                pl.BlockSpec((tile_rows, 1), lambda i: (i, 0)),  # labels tile
            ],
            out_specs=pl.BlockSpec((1, 1), lambda i: (0, 0)),
            scratch_shapes=[pltpu.VMEM((1, 1), jnp.float32)],
        ),
        compiler_params=pltpu.CompilerParams(
            dimension_semantics=("arbitrary",),  # NLL accumulation across tiles
        ),
        cost_estimate=cost,
    )(e1, e2, w1a, w1b, b1_2d, w2f, b2_2d, lbl)
    return loss[0, 0]


def _reference(embed, index_1, index_2, labels, w1, b1, w2, b2):
    e1 = jnp.take(embed, index_1, axis=0)
    e2 = jnp.take(embed, index_2, axis=0)
    x = jnp.concatenate([e1, e2], axis=1)
    h1 = jax.nn.relu(x @ w1 + b1)
    h = h1 @ w2 + b2
    logp = jax.nn.log_softmax(h, axis=1)
    return -jnp.mean(logp[jnp.arange(labels.shape[0]), labels])


if __name__ == "__main__":
    # Small, module-consistent shapes.
    N = 16   # number of embeddings (rows of `embed`)
    D = 16   # embedding dim -> input_size = 2*D = 32
    H = 32   # hidden_size1
    C = 8    # out_size (number of SSL classes)
    P = 20   # number of (index_1, index_2, label) pairs (not a multiple of 8)

    key = jax.random.PRNGKey(0)
    k_embed, k_i1, k_i2, k_lbl, k_w1, k_b1, k_w2, k_b2 = jax.random.split(key, 8)

    embed = jax.random.normal(k_embed, (N, D), dtype=jnp.float32)

    # Synthetic ssl_index_label (replaces np.loadtxt of ssl_label_dir).
    index_1 = jax.random.randint(k_i1, (P,), 0, N, dtype=jnp.int32)
    index_2 = jax.random.randint(k_i2, (P,), 0, N, dtype=jnp.int32)
    labels = jax.random.randint(k_lbl, (P,), 0, C, dtype=jnp.int32)

    # Linear params, stored pre-transposed as [in, out].
    lim1 = 1.0 / jnp.sqrt(2.0 * D)
    lim2 = 1.0 / jnp.sqrt(1.0 * H)
    w1 = jax.random.uniform(k_w1, (2 * D, H), minval=-lim1, maxval=lim1, dtype=jnp.float32)
    b1 = jax.random.uniform(k_b1, (H,), minval=-lim1, maxval=lim1, dtype=jnp.float32)
    w2 = jax.random.uniform(k_w2, (H, C), minval=-lim2, maxval=lim2, dtype=jnp.float32)
    b2 = jax.random.uniform(k_b2, (C,), minval=-lim2, maxval=lim2, dtype=jnp.float32)

    # tile_rows=8 -> grid of 3 row-tiles, last tile half-masked (exercises the
    # pipelined accumulation + tail masking path).
    loss = ssl_forward(embed, index_1, index_2, labels, w1, b1, w2, b2, tile_rows=8)
    loss = jax.block_until_ready(loss)

    ref = _reference(embed, index_1, index_2, labels, w1, b1, w2, b2)
    assert jnp.allclose(loss, ref, atol=1e-5, rtol=1e-5), (loss, ref)

    print("KERNEL_OK")
</pallas_src>

<mosaic_0001>
module attributes {stable_mosaic.version = 11 : i64} {
  func.func @ssl_loss_kernel(%arg0: i32, %arg1: memref<8x16xf32, #tpu.memory_space<vmem>>, %arg2: memref<8x16xf32, #tpu.memory_space<vmem>>, %arg3: memref<16x32xf32, #tpu.memory_space<vmem>>, %arg4: memref<16x32xf32, #tpu.memory_space<vmem>>, %arg5: memref<1x32xf32, #tpu.memory_space<vmem>>, %arg6: memref<32x8xf32, #tpu.memory_space<vmem>>, %arg7: memref<1x8xf32, #tpu.memory_space<vmem>>, %arg8: memref<8x1xi32, #tpu.memory_space<vmem>>, %arg9: memref<1x1xf32, #tpu.memory_space<vmem>>, %arg10: memref<1x1xf32, #tpu.memory_space<vmem>>) attributes {dimension_semantics = [#tpu.dimension_semantics<arbitrary>], iteration_bounds = array<i64: 3>, scalar_prefetch = 0 : i64, scratch_operands = 1 : i64, tpu.core_type = #tpu.core_type<tc>, window_params = [{transform_indices = @transform_0, window_bounds = array<i64: 8, 16>}, {transform_indices = @transform_1, window_bounds = array<i64: 8, 16>}, {pipeline_mode = #tpu.pipeline_mode<synchronous>, transform_indices = @transform_2, window_bounds = array<i64: 16, 32>}, {pipeline_mode = #tpu.pipeline_mode<synchronous>, transform_indices = @transform_3, window_bounds = array<i64: 16, 32>}, {pipeline_mode = #tpu.pipeline_mode<synchronous>, transform_indices = @transform_4, window_bounds = array<i64: 1, 32>}, {pipeline_mode = #tpu.pipeline_mode<synchronous>, transform_indices = @transform_5, window_bounds = array<i64: 32, 8>}, {pipeline_mode = #tpu.pipeline_mode<synchronous>, transform_indices = @transform_6, window_bounds = array<i64: 1, 8>}, {transform_indices = @transform_7, window_bounds = array<i64: 8, 1>}, {pipeline_mode = #tpu.pipeline_mode<synchronous>, transform_indices = @transform_8, window_bounds = array<i64: 1, 1>}]} {
    %c0_i32 = arith.constant 0 : i32
    %0 = arith.cmpi eq, %arg0, %c0_i32 : i32
    %1 = arith.extui %0 : i1 to i32
    %c0_i32_0 = arith.constant 0 : i32
    %2 = arith.cmpi ne, %1, %c0_i32_0 : i32
    scf.if %2 {
      %cst_29 = arith.constant 0.000000e+00 : f32
      %55 = vector.broadcast %cst_29 : f32 to vector<1x1xf32>
      %c0_30 = arith.constant 0 : index
      %c0_31 = arith.constant 0 : index
      %56 = vector.load %arg10[%c0_30, %c0_31] : memref<1x1xf32, #tpu.memory_space<vmem>>, vector<1x1xf32>
      tpu.vector_store %arg10[%c0_30, %c0_31], %55 {strides = array<i32>} : memref<1x1xf32, #tpu.memory_space<vmem>>, vector<1x1xf32>,
    } else {
    }
    %c0 = arith.constant 0 : index
    %c0_1 = arith.constant 0 : index
    %3 = vector.load %arg1[%c0, %c0_1] : memref<8x16xf32, #tpu.memory_space<vmem>>, vector<8x16xf32>
    %c0_2 = arith.constant 0 : index
    %c0_3 = arith.constant 0 : index
    %4 = vector.load %arg3[%c0_2, %c0_3] : memref<16x32xf32, #tpu.memory_space<vmem>>, vector<16x32xf32>
    %cst = arith.constant dense<0.000000e+00> : vector<8x32xf32>
    %5 = tpu.matmul %3, %4, %cst {dimension_numbers = #tpu.dot_dimension_numbers<[1], [0], [0], [1], [0, 0, 1, 1], [], []>} : vector<8x16xf32>, vector<16x32xf32>, vector<8x32xf32> -> vector<8x32xf32>
    %c0_4 = arith.constant 0 : index
    %c0_5 = arith.constant 0 : index
    %6 = vector.load %arg2[%c0_4, %c0_5] : memref<8x16xf32, #tpu.memory_space<vmem>>, vector<8x16xf32>
    %c0_6 = arith.constant 0 : index
    %c0_7 = arith.constant 0 : index
    %7 = vector.load %arg4[%c0_6, %c0_7] : memref<16x32xf32, #tpu.memory_space<vmem>>, vector<16x32xf32>
    %cst_8 = arith.constant dense<0.000000e+00> : vector<8x32xf32>
    %8 = tpu.matmul %6, %7, %cst_8 {dimension_numbers = #tpu.dot_dimension_numbers<[1], [0], [0], [1], [0, 0, 1, 1], [], []>} : vector<8x16xf32>, vector<16x32xf32>, vector<8x32xf32> -> vector<8x32xf32>
    %9 = arith.addf %5, %8 : vector<8x32xf32>
    %c0_9 = arith.constant 0 : index
    %c0_10 = arith.constant 0 : index
    %10 = vector.load %arg5[%c0_9, %c0_10] : memref<1x32xf32, #tpu.memory_space<vmem>>, vector<1x32xf32>
    %11 = vector.broadcast %10 : vector<1x32xf32> to vector<8x32xf32>
    %12 = arith.addf %9, %11 : vector<8x32xf32>
    %cst_11 = arith.constant 0.000000e+00 : f32
    %13 = vector.broadcast %cst_11 : f32 to vector<8x32xf32>
    %14 = arith.maximumf %12, %13 : vector<8x32xf32>
    %c0_12 = arith.constant 0 : index
    %c0_13 = arith.constant 0 : index
    %15 = vector.load %arg6[%c0_12, %c0_13] : memref<32x8xf32, #tpu.memory_space<vmem>>, vector<32x8xf32>
    %cst_14 = arith.constant dense<0.000000e+00> : vector<8x8xf32>
    %16 = tpu.matmul %14, %15, %cst_14 {dimension_numbers = #tpu.dot_dimension_numbers<[1], [0], [0], [1], [0, 0, 1, 1], [], []>} : vector<8x32xf32>, vector<32x8xf32>, vector<8x8xf32> -> vector<8x8xf32>
    %c0_15 = arith.constant 0 : index
    %c0_16 = arith.constant 0 : index
    %17 = vector.load %arg7[%c0_15, %c0_16] : memref<1x8xf32, #tpu.memory_space<vmem>>, vector<1x8xf32>
    %18 = vector.broadcast %17 : vector<1x8xf32> to vector<8x8xf32>
    %19 = arith.addf %16, %18 : vector<8x8xf32>
    %cst_17 = arith.constant dense<0xFF800000> : vector<8xf32>
    %20 = vector.multi_reduction <maximumf>, %19, %cst_17 [1] : vector<8x8xf32> to vector<8xf32>
    %21 = vector.shape_cast %20 : vector<8xf32> to vector<8x1xf32>
    %22 = vector.broadcast %21 : vector<8x1xf32> to vector<8x8xf32>
    %23 = arith.subf %19, %22 : vector<8x8xf32>
    %24 = math.exp %23 : vector<8x8xf32>
    %cst_18 = arith.constant dense<0.000000e+00> : vector<8xf32>
    %25 = vector.multi_reduction <add>, %24, %cst_18 [1] : vector<8x8xf32> to vector<8xf32>
    %26 = vector.shape_cast %25 : vector<8xf32> to vector<8x1xf32>
    %27 = math.log %26 : vector<8x1xf32>
    %28 = tpu.iota {dimensions = array<i32: 1>} : vector<8x8xi32>
    %c0_19 = arith.constant 0 : index
    %c0_20 = arith.constant 0 : index
    %29 = vector.load %arg8[%c0_19, %c0_20] : memref<8x1xi32, #tpu.memory_space<vmem>>, vector<8x1xi32>
    %30 = vector.broadcast %29 : vector<8x1xi32> to vector<8x8xi32>
    %31 = arith.cmpi eq, %28, %30 : vector<8x8xi32>
    %32 = arith.extui %31 : vector<8x8xi1> to vector<8x8xi32>
    %33 = arith.sitofp %32 : vector<8x8xi32> to vector<8x8xf32>
    %34 = arith.mulf %33, %19 : vector<8x8xf32>
    %cst_21 = arith.constant dense<0.000000e+00> : vector<8xf32>
    %35 = vector.multi_reduction <add>, %34, %cst_21 [1] : vector<8x8xf32> to vector<8xf32>
    %36 = vector.shape_cast %35 : vector<8xf32> to vector<8x1xf32>
    %37 = arith.addf %21, %27 : vector<8x1xf32>
    %38 = arith.subf %37, %36 : vector<8x1xf32>
    %c8_i32 = arith.constant 8 : i32
    %39 = arith.muli %arg0, %c8_i32 : i32
    %40 = tpu.iota {dimensions = array<i32: 0>} : vector<8x1xi32>
    %41 = vector.broadcast %39 : i32 to vector<8x1xi32>
    %42 = arith.addi %41, %40 : vector<8x1xi32>
    %c20_i32 = arith.constant 20 : i32
    %43 = vector.broadcast %c20_i32 : i32 to vector<8x1xi32>
    %44 = arith.cmpi slt, %42, %43 : vector<8x1xi32>
    %cst_22 = arith.constant 0.000000e+00 : f32
    %45 = vector.broadcast %cst_22 : f32 to vector<8x1xf32>
    %46 = arith.select %44, %38, %45 : vector<8x1xi1>, vector<8x1xf32>
    %c0_23 = arith.constant 0 : index
    %c0_24 = arith.constant 0 : index
    %47 = vector.load %arg10[%c0_23, %c0_24] : memref<1x1xf32, #tpu.memory_space<vmem>>, vector<1x1xf32>
    %cst_25 = arith.constant dense<0.000000e+00> : vector<1xf32>
    %48 = vector.multi_reduction <add>, %46, %cst_25 [0] : vector<8x1xf32> to vector<1xf32>
    %49 = vector.shape_cast %48 : vector<1xf32> to vector<1x1xf32>
    %50 = arith.addf %47, %49 : vector<1x1xf32>
    %c0_26 = arith.constant 0 : index
    %c0_27 = arith.constant 0 : index
    %51 = vector.load %arg10[%c0_26, %c0_27] : memref<1x1xf32, #tpu.memory_space<vmem>>, vector<1x1xf32>
    tpu.vector_store %arg10[%c0_26, %c0_27], %50 {strides = array<i32>} : memref<1x1xf32, #tpu.memory_space<vmem>>, vector<1x1xf32>,
    %c2_i32 = arith.constant 2 : i32
    %52 = arith.cmpi eq, %arg0, %c2_i32 : i32
    %53 = arith.extui %52 : i1 to i32
    %c0_i32_28 = arith.constant 0 : i32
    %54 = arith.cmpi ne, %53, %c0_i32_28 : i32
    scf.if %54 {
      %c0_29 = arith.constant 0 : index
      %c0_30 = arith.constant 0 : index
      %55 = vector.load %arg10[%c0_29, %c0_30] : memref<1x1xf32, #tpu.memory_space<vmem>>, vector<1x1xf32>
      %cst_31 = arith.constant 2.000000e+01 : f32
      %56 = vector.broadcast %cst_31 : f32 to vector<1x1xf32>
      %57 = arith.divf %55, %56 : vector<1x1xf32>
      %c0_32 = arith.constant 0 : index
      %c0_33 = arith.constant 0 : index
      %58 = vector.load %arg9[%c0_32, %c0_33] : memref<1x1xf32, #tpu.memory_space<vmem>>, vector<1x1xf32>
      tpu.vector_store %arg9[%c0_32, %c0_33], %57 {strides = array<i32>} : memref<1x1xf32, #tpu.memory_space<vmem>>, vector<1x1xf32>,
    } else {
    }
    return
  }
  func.func @transform_0(%arg0: i32) -> (i32, i32) {
    %c0_i32 = arith.constant 0 : i32
    %c0_i32_0 = arith.constant 0 : i32
    return %arg0, %c0_i32 : i32, i32
  }
  func.func @transform_1(%arg0: i32) -> (i32, i32) {
    %c0_i32 = arith.constant 0 : i32
    %c0_i32_0 = arith.constant 0 : i32
    return %arg0, %c0_i32 : i32, i32
  }
  func.func @transform_2(%arg0: i32) -> (i32, i32) {
    %c0_i32 = arith.constant 0 : i32
    %c0_i32_0 = arith.constant 0 : i32
    %c0_i32_1 = arith.constant 0 : i32
    return %c0_i32, %c0_i32_0 : i32, i32
  }
  func.func @transform_3(%arg0: i32) -> (i32, i32) {
    %c0_i32 = arith.constant 0 : i32
    %c0_i32_0 = arith.constant 0 : i32
    %c0_i32_1 = arith.constant 0 : i32
    return %c0_i32, %c0_i32_0 : i32, i32
  }
  func.func @transform_4(%arg0: i32) -> (i32, i32) {
    %c0_i32 = arith.constant 0 : i32
    %c0_i32_0 = arith.constant 0 : i32
    %c0_i32_1 = arith.constant 0 : i32
    return %c0_i32, %c0_i32_0 : i32, i32
  }
  func.func @transform_5(%arg0: i32) -> (i32, i32) {
    %c0_i32 = arith.constant 0 : i32
    %c0_i32_0 = arith.constant 0 : i32
    %c0_i32_1 = arith.constant 0 : i32
    return %c0_i32, %c0_i32_0 : i32, i32
  }
  func.func @transform_6(%arg0: i32) -> (i32, i32) {
    %c0_i32 = arith.constant 0 : i32
    %c0_i32_0 = arith.constant 0 : i32
    %c0_i32_1 = arith.constant 0 : i32
    return %c0_i32, %c0_i32_0 : i32, i32
  }
  func.func @transform_7(%arg0: i32) -> (i32, i32) {
    %c0_i32 = arith.constant 0 : i32
    %c0_i32_0 = arith.constant 0 : i32
    return %arg0, %c0_i32 : i32, i32
  }
  func.func @transform_8(%arg0: i32) -> (i32, i32) {
    %c0_i32 = arith.constant 0 : i32
    %c0_i32_0 = arith.constant 0 : i32
    %c0_i32_1 = arith.constant 0 : i32
    return %c0_i32, %c0_i32_0 : i32, i32
  }
}

</mosaic_0001>

<bundles_post_ra>
// kernel: tpu_custom_call.1
= control target key start
LH: loop header
LB: loop body
LE: loop exit
PB: predicated region body
PF: predicated region fallthrough
CT: control target
= control target key end

     0   :  { %13 = vsyncpa [#allocation4], 0  ;;  %s864_s27 = smov 0   ;;  %s946_s0 = inlined_call_operand.vmem [shape: f32[24,16], index: 0, kind: input, shape index: {}]   ;;  %s947_s1 = inlined_call_operand.vmem [shape: f32[24,16], index: 1, kind: input, shape index: {}]   ;;  %s948_s2 = inlined_call_operand.vmem [shape: f32[16,32], index: 2, kind: input, shape index: {}]   ;;  %s949_s3 = inlined_call_operand.vmem [shape: f32[16,32], index: 3, kind: input, shape index: {}]   ;;  %s950_s4 = inlined_call_operand.vmem [shape: f32[1,32], index: 4, kind: input, shape index: {}]   ;;  %s951_s5 = inlined_call_operand.vmem [shape: f32[32,8], index: 5, kind: input, shape index: {}]   ;;  %s952_s6 = inlined_call_operand.vmem [shape: f32[1,8], index: 6, kind: input, shape index: {}]   ;;  %s953_s7 = inlined_call_operand.vmem [shape: s32[24,1], index: 7, kind: input, shape index: {}]   ;;  %s954_s8 = inlined_call_operand.hbm [shape: f32[1,1], index: 8, kind: output, shape index: {}]  }
   0x1 LB: > { %s870_s28 = sadd.s32 4294967295, %s812_s27   ;;  %p701_p0 = scmp.ge.s32.totalorder %s812_s27, 1  ;;  %s812_s27 = sphi %s864_s27, %s19_s27  }
   0x2   : > { %p275_p1 = scmp.lt.s32.totalorder %s812_s27, 4 }
   0x4   : > { %p276_p2 = pnand %p701_p0, %p275_p1 }
   0x5   : > { %p311_p3 = scmp.lt.s32.totalorder (!%p276_p2), %s870_s28, 2  ;;  %p705_p4 = scmp.ne.s32.totalorder (!%p276_p2), %s870_s28, 0 }
   0x6   : > { %279 = sbr.rel (%p276_p2) target bundleno = 779 (0x30b), region = 52 }
   0xb   : > { %s312_s29 = scalar_select %p311_p3, %s870_s28, 2 }
   0xc   : > { %326 = sbr.rel (%p705_p4) target bundleno = 19 (0x13), region = 56 }
   0xd   : > { %s876_s30 = sshll.u32 %s312_s29, 3 }
   0xe   : > { %s314_s11 = scalar_lea.vmem %s946_s0, %s876_s30  ;;  %s318_s14 = scalar_lea.vmem %s947_s1, %s876_s30 }
   0xf   : > { %s322_s17 = scalar_lea.vmem %s953_s7, %s876_s30 }
  0x11   : > { %vm327_vm0 = vcmask 0   ;;  %v814_v0 = vmov 0.0  }
  0x12   : > { %328 = vst.msk [vmem:[#allocation2] sm:$0x1] %vm327_vm0, %v814_v0 }
  0x13 PF: > { %v334_v1 = vld [vmem:[%s949_s3 + $0x8] sm:$0xff]  ;;  %v815_v2 = vmov 0.0   ;;  %v333_v3 = vld [vmem:[%s949_s3] sm:$0xff]  ;;  %vm816_vm1 = vmmov 0   ;;  %vm335_vm2 = vcmask 130048   ;;  %v494_v8 = vld [vmem:[%s951_s5 + $0x18] sm:$0xff]  ;;  %v588_v30 = vlaneseq }
  0x14   : > { %729 = vmatprep.subr.mxu1 %v815_v2  ;;  %733 = vmatprep.mubr.msk.f32.mxu1 %vm816_vm1, %v815_v2  ;;  %v332_v4 = vld [vmem:[%s318_s14] sm:$0xff]  ;;  %v331_v5 = vld [vmem:[%s948_s2 + $0x8] sm:$0xff]  ;;  %v493_v9 = vld [vmem:[%s951_s5 + $0x10] sm:$0xff]  ;;  %vm502_vm3 = vcmask 261120   ;;  %v817_v20 = vmov 0   ;;  %vm576_vm4 = vcmask 64512  }
  0x15   : > { %730 = vmatpush3.msra.mxu1 %v334_v1  ;;  %743 = vmatprep.subr.mxu0 %v815_v2  ;;  %v330_v6 = vld [vmem:[%s948_s2] sm:$0xff]  ;;  %v492_v10 = vld [vmem:[%s951_s5 + $0x8] sm:$0xff]  ;;  %v589_v31 = vand.u32 127, %v588_v30  ;;  %s712_s30 = sshll.u32 %s870_s28, 3  ;;  %v605_v39 = vshrl.u32 %v588_v30, 7  ;;  %vm618_vm7 = vcmask 0  }
  0x16   : > { %731 = vmatprep.subr.mxu1 %v815_v2  ;;  %751 = vmatprep.mubr.msk.f32.mxu0 %vm816_vm1, %v815_v2  ;;  %v329_v7 = vld [vmem:[%s314_s11] sm:$0xff]  ;;  %v606_v40 = vstv %s712_s30  ;;  %p713_p5 = scmp.ne.s32.totalorder %s870_s28, 2 }
  0x17   : > { %732 = vmatpush3.msra.mxu1 %v333_v3  ;;  %744 = vmatpush3.msra.mxu0 %v494_v8  ;;  %v491_v11 = vld [vmem:[%s951_s5] sm:$0xff]  ;;  %v607_v42 = vadd.s32 %v606_v40, %v605_v39 }
  0x18   : > { %734 = vmatmul.mubr.msk.f32.vlgmr.msra.gmra.mxu1 %vm335_vm2, %v332_v4  ;;  %736 = vmatprep.subr.mxu1 %v815_v2  ;;  %v708_v15 = vld [vmem:[%s950_s4] ss:$0 sm:$0xff] }
  0x19   : > { %737 = vmatpush3.msra.mxu1 %v331_v5  ;;  %740 = vmatprep.mubr.msk.f32.mxu1 %vm816_vm1, %v815_v2  ;;  %v709_v21 = vld [vmem:[%s952_s6] ss:$0 sm:$0xff]  ;;  %vm608_vm6 = vcmp.lt.s32.totalorder %v607_v42, 20 }
  0x1a   : > { %738 = vmatprep.subr.mxu1 %v815_v2  ;;  %745 = vmatprep.subr.mxu0 %v815_v2  ;;  %v590_v26 = vld [vmem:[%s322_s17] sm:$0xff] }
  0x1b   : > { %739 = vmatpush3.msra.mxu1 %v330_v6  ;;  %746 = vmatpush3.msra.mxu0 %v493_v9  ;;  %v610_v53 = vld [vmem:[#allocation2] sm:$0x1] }
  0x1c   : > { %741 = vmatmul.mubr.msk.f32.vlgmr.msra.gmra.mxu1 %vm335_vm2, %v329_v7  ;;  %747 = vmatprep.subr.mxu0 %v815_v2 }
  0x1d   : > { %748 = vmatpush3.msra.mxu0 %v492_v10  ;;  %773 = vset.pattern.permute.xlu0 %v817_v20 }
  0x1e   : > { %749 = vmatprep.subr.mxu0 %v815_v2 }
  0x1f   : > { %750 = vmatpush3.msra.mxu0 %v491_v11 }
  0xd8   : > { %v405_v12 = vpop.f32.mrf.mxu1 }
  0xda   : > { %v735_v13 = vpop.f32.mrf.mxu1 }
  0xdc   : > { %v478_v14 = vpop.f32.mrf.mxu1 }
  0xdd   : > { %v479_v16 = vadd.f32 %v478_v14, %v405_v12 }
  0xde   : > { %v742_v17 = vpop.f32.mrf.mxu1 }
  0xdf   : > { %v489_v18 = vadd.f32 %v708_v15, %v479_v16 }
  0xe1   : > { %v490_v19 = vmax.f32 %v489_v18, 0.0 }
  0xe3   : > { %752 = vmatmul.mubr.msk.f32.vlgmr.msra.gmra.mxu0 %vm502_vm3, %v490_v19 }
 0x1a3   : > { %v572_v22 = vpop.f32.mrf.mxu0 }
 0x1a4   : > { %v573_v23 = vadd.f32 %v709_v21, %v572_v22 }
 0x1a5   : > { %v753_v24 = vpop.f32.mrf.mxu0 }
 0x1a6   : > { %v577_v25 = vsel %vm576_vm4, %v573_v23, -inf }
 0x1a7   : > { %578 = vmax.xlane.f32.xlu0 %v577_v25 }
 0x1bd   : > { %592 = vperm.xlu0 %773, %v590_v26  }
 0x230   : > { %v579_v27 = vpop.xlane.xlu0 %578 }
 0x231   : > { %v580_v28 = vsub.f32 %v573_v23, %v579_v27 }
 0x233   : > { %v581_v29 = vmul.f32 1.442695, %v580_v28 }
 0x235   : > { %774 = vpow2.f32 %v581_v29 }
 0x238   : > { %v593_v32 = vpop.permute.xlu0 %592 }
 0x239   : > { %vm594_vm5 = vcmp.eq.s32.totalorder %v589_v31, %v593_v32 }
 0x23a   : > { %v711_v33 = vsel %vm594_vm5, 1.0, %v815_v2 }
 0x23b   : > { %v597_v36 = vmul.f32 %v711_v33, %v573_v23 }
 0x23d   : > { %v598_v37 = vsel %vm576_vm4, %v597_v36, 0.0 }
 0x242   : > { %v775_v34 = vpop.eup %774 }
 0x243   : > { %v583_v35 = vsel %vm576_vm4, %v775_v34, 0.0 }
 0x244   : > { %584 = vadd.xlane.f32.xlu1 %v583_v35 }
 0x248   : > { %599 = vadd.xlane.f32.xlu1 %v598_v37 }
 0x2cd   : > { %v585_v38 = vpop.xlane.xlu1 %584 }
 0x2ce   : > { %776 = vlog2.f32 %v585_v38 }
 0x2d1   : > { %v600_v45 = vpop.xlane.xlu1 %599 }
 0x2db   : > { %v777_v41 = vpop.eup %776 }
 0x2dc   : > { %v587_v43 = vmul.f32 0.6931472, %v777_v41 }
 0x2de   : > { %v601_v44 = vadd.f32 %v587_v43, %v579_v27 }
 0x2e0   : > { %v602_v46 = vsub.f32 %v601_v44, %v600_v45 }
 0x2e2   : > { %v609_v47 = vsel %vm608_vm6, %v602_v46, 0.0 }
 0x2e3   : > { %v611_v48 = vrot.slane %v609_v47, 4 }
 0x2e5   : > { %v612_v49 = vadd.f32 %v611_v48, %v609_v47 }
 0x2e7   : > { %v613_v50 = vrot.slane %v612_v49, 2 }
 0x2e9   : > { %v614_v51 = vadd.f32 %v613_v50, %v612_v49 }
 0x2eb   : > { %v615_v52 = vrot.slane %v614_v51, 1 }
 0x2ed   : > { %v616_v54 = vadd.f32 %v615_v52, %v614_v51  ;;  %623 = sbr.rel (%p713_p5) target bundleno = 764 (0x2fc), region = 60 }
 0x2ef   : > { %v617_v55 = vadd.f32 %v616_v54, %v610_v53 }
 0x2f1   : > { %619 = vst.msk [vmem:[#allocation2] sm:$0x1] %vm618_vm7, %v617_v55 }
 0x2f8   : > { %v624_v56 = vld [vmem:[#allocation2] sm:$0x1] }
 0x2f9   : > { %v626_v57 = vmul.f32 0.05, %v624_v56 }
 0x2fb   : > { %627 = vst.msk [vmem:[#allocation3] sm:$0x1] %vm618_vm7, %v626_v57 }
 0x2fc PF: > { %p758_p6 = scmp.eq.s32.totalorder %s870_s28, 2  ;;  %s818_s17 = smov [#allocation3]  }
 0x2fd   : > { %s635_s22 = sshll.u32 %s818_s17, 4  ;;  %s636_s22 = int_to_ptr.vmem [resolvable:$true] %s635_s22 }
 0x2fe   : > { %s778_s23 = scalar_lea.vmem %s636_s22, 16  ;;  %s784_s24 = scalar_lea.vmem %s636_s22, 32 }
 0x2ff   : > { %p779_p7 = scmp.ne.s32.totalorder %s636_s22, %s778_s23  ;;  %p785_p10 = scmp.lt.s32.totalorder %s636_s22, %s636_s22 }
 0x300   : > { %p786_p11 = scmp.lt.s32.totalorder %s784_s24, %s778_s23 }
 0x301   : > { %p780_p8 = pnand %p779_p7, %p758_p6 }
 0x302   : > { %p787_p12 = por %p786_p11, %p785_p10 }
 0x303   : > { %p781_p9 = pneg %p780_p8 }
 0x305   : > { %p788_p13 = pnand %p787_p12, %p781_p9 }
 0x307   : > { %791 = shalt.err (!%p788_p13)
}
 0x308   : > { %755 = dma.vmem_to_hbm [thread:$0]  (%p758_p6), %s636_s22, 16, %s954_s8, [#allocation4]  }
 0x309   : > { %807 = dma.done.wait (%p758_p6), [#allocation4], 16  }
 0x30a   : > { %809 = vsyncadd (%p758_p6), [#allocation4], 4294967280 }
 0x30b PF: > { %s19_s27 = sadd.s32 1, %s812_s27  }
 0x30c   : > { %p16_p0 = scmp.ge.s32.totalorder %s19_s27, 5  }
 0x30e   :  { %18 = sbr.rel (!%p16_p0) target bundleno = 1 (0x1), region = 93 }
 0x313   :  { %648 = vsyncpa [#allocation4], 1 }
 0x314   :  { %650 = vsyncpa [#allocation4 + $0x1], 1 }

</bundles_post_ra>
